<compile_context>
chip_gen: v5e
topology: v5e:2x2
jax: 0.10.0
libtpu: 0.0.40
codegen_flags: <defaults>
</compile_context>

<pallas_src>
import functools

import jax
import jax.numpy as jnp
from jax import lax
from jax.experimental import pallas as pl
from jax.experimental.pallas import tpu as pltpu

# "args" from the original repo, fixed deterministically here.
KERNEL_SIZE = 3          # args.kernelSize (odd -> 'same' padding along H)
CATE_NUM = 4             # args.cateNum (residual concat requires 4)
NEG_SLOPE = 0.01         # nn.LeakyReLU default negative_slope


def _tem_cnn_kernel(x_ref, w_ref, b_ref, o_ref, *, k, hb, h_valid, neg_slope):
    """Fused 4xConv3d + bias + residual + LeakyReLU for one group of (n,d) slabs.

    x_ref: (G*HB, W*C)   activations (bf16/f32).  HB rows per (n,d) slab, NOT
                         H-padded: the conv's 'same' zero padding along H is
                         realised in-kernel (roll + boundary mask).
    w_ref: (K, W*C, 4*O) packed per-tap conv weights, same dtype as x.
    b_ref: (1, 4*O)      f32 packed biases.
    o_ref: (G*HB, 4*O)   output block.
    """
    rows, wc = x_ref.shape
    pad = (k - 1) // 2

    x = x_ref[...]                                     # native dtype -> MXU directly
    # Within-slab time index of every merged row (for boundary masking).
    t = lax.broadcasted_iota(jnp.int32, (rows, 1), 0) % hb

    # bias + residual.  The residual is the centre tap of this same block
    # (output_dim == input_dim and the (cate, o) column order == (cate, c)),
    # so no separate residual stream; the f32 upcast is fused into the add.
    acc = b_ref[...] + x.astype(jnp.float32)

    for kh in range(k):                                # static unroll, K is small
        dh = kh - pad
        # Full-rows matmul against this tap's weights; f32 MXU accumulation.
        y = jnp.dot(x, w_ref[kh], preferred_element_type=jnp.float32)
        if dh != 0:
            # Output row t consumes input row t+dh: shift the f32 result by -dh
            # rows (XLU sublane rotate, slack slot) and zero the rows whose
            # source lies outside [0, h_valid) of its own slab -- this is the
            # conv's zero 'same' padding and also kills cross-slab wrap rows.
            y = pltpu.roll(y, shift=(-dh) % rows, axis=0)
            ok = jnp.logical_and(t + dh >= 0, t + dh <= h_valid - 1)
            y = jnp.where(ok, y, 0.0)
        acc = acc + y

    o_ref[...] = jnp.where(acc >= 0, acc, neg_slope * acc).astype(o_ref.dtype)


def _default_vmem_limit():
    """v5e/v6e have 128 MiB physical VMEM -> 64 MiB limit; v7x only 64 MiB
    -> stay at 48 MiB (also the safe default for unknown chips)."""
    try:
        kind = jax.devices()[0].device_kind.lower()
    except Exception:  # pragma: no cover
        kind = ""
    return (64 << 20) if ("v5" in kind or "v6" in kind) else (48 << 20)


def _pick_group(nd, hb, wc, ncol, in_bytes, out_bytes, *,
                target_rows=4096, block_budget_bytes=8 << 20, min_steps=4):
    """(n,d) slabs per grid step.

    Targets ~4096 output rows (~85%+ of HBM roofline in Pallas tile sweeps) or
    ~8 MiB of (in+out) block -- double-buffered plus in-kernel f32 temporaries
    this stays well under the 48 MiB VMEM limit -- while keeping >= min_steps
    grid steps so both v7x TensorCores get work and the pipeline stays full."""
    per_slab_bytes = hb * (wc * in_bytes + ncol * out_bytes)
    g = max(1, min(target_rows // hb, block_budget_bytes // per_slab_bytes))
    if nd > min_steps:
        g = min(g, max(1, nd // min_steps))
    return max(1, min(g, nd))


def tem_cnn_local_forward_channels_last(x_cl, weights, biases, *, out_dtype=None):
    """x_cl: (N, D, H, CATE_NUM, C) channels-last activations (bf16 or f32).

    The kernel consumes x_cl as-is: no H-pad / dtype-cast pre-pass (the halo is
    handled in-kernel), so bf16 channels-last producers pay zero extra HBM
    traffic.  Returns (N, D, H, CATE_NUM, O) in `out_dtype` (default: x dtype).
    """
    n, d, h, w, c = x_cl.shape
    assert w == CATE_NUM, f"cateNum mismatch: {w} != {CATE_NUM}"
    k = KERNEL_SIZE
    assert k % 2 == 1, "kernelSize must be odd for 'same' padding"
    o_dim = weights[0].shape[0]
    assert o_dim == c, "residual add requires output_dim == input_dim"
    assert len(weights) == CATE_NUM and len(biases) == CATE_NUM

    nd = n * d
    wc = w * c
    ncol = CATE_NUM * o_dim                     # == wc since O == C
    out_dtype = x_cl.dtype if out_dtype is None else out_dtype

    # Pad H to a sublane multiple only when needed (keeps the merged-row layout
    # clean); common H values (incl. the demo) need no pad -> reshape-only path.
    hb = ((h + 7) // 8) * 8
    slab = x_cl.reshape(nd, h, wc)
    if hb != h:
        slab = jnp.pad(slab, ((0, 0), (0, hb - h), (0, 0)))
    slab = slab.reshape(nd * hb, wc)            # 2-D, lane-dense presentation

    # Pack the four Conv3d weights as (K, W*C, 4*O): rows (w, c), cols (cate, o).
    # Stored in the activation dtype so the MXU runs the native bf16 path.
    w_taps = [jnp.transpose(wt[:, :, 0], (2, 3, 1, 0)).reshape(k, wc, o_dim)
              for wt in weights]
    w_comb = jnp.concatenate(w_taps, axis=-1).astype(x_cl.dtype)      # (K, WC, 4O)
    b_comb = jnp.concatenate(biases).reshape(1, ncol).astype(jnp.float32)

    in_bytes = jnp.dtype(x_cl.dtype).itemsize
    out_bytes = jnp.dtype(out_dtype).itemsize
    g = _pick_group(nd, hb, wc, ncol, in_bytes, out_bytes)
    rows_per_step = g * hb
    grid = (pl.cdiv(nd, g),)                    # partial tail block is fine

    kernel = functools.partial(_tem_cnn_kernel, k=k, hb=hb, h_valid=h,
                               neg_slope=NEG_SLOPE)
    total_rows = nd * hb
    cost = pl.CostEstimate(
        flops=2 * total_rows * wc * ncol * k,
        transcendentals=0,
        bytes_accessed=(total_rows * wc * in_bytes
                        + total_rows * ncol * out_bytes
                        + k * wc * ncol * in_bytes + 4 * ncol))

    y = pl.pallas_call(
        kernel,
        out_shape=jax.ShapeDtypeStruct((total_rows, ncol), out_dtype),
        grid_spec=pltpu.PrefetchScalarGridSpec(
            num_scalar_prefetch=0,
            grid=grid,
            in_specs=[
                # NOTE: add pipeline_mode=pl.Buffered(3) here if traces show
                # exposed DMA once the step count drops on very large inputs.
                pl.BlockSpec((rows_per_step, wc), lambda i: (i, 0)),   # activations
                pl.BlockSpec((k, wc, ncol), lambda i: (0, 0, 0)),      # weights (resident)
                pl.BlockSpec((1, ncol), lambda i: (0, 0)),             # bias (resident)
            ],
            out_specs=pl.BlockSpec((rows_per_step, ncol), lambda i: (i, 0)),
        ),
        compiler_params=pltpu.CompilerParams(
            dimension_semantics=("parallel",),
            vmem_limit_bytes=_default_vmem_limit(),
        ),
        cost_estimate=cost,
    )(slab, w_comb, b_comb)

    y = y.reshape(nd, hb, CATE_NUM, o_dim)[:, :h]
    return y.reshape(n, d, h, CATE_NUM, o_dim)


def tem_cnn_local_forward(embeds, weights, biases, *, slab_dtype=jnp.bfloat16,
                          out_dtype=jnp.float32):
    """embeds: (N, C, D, H, CATE_NUM), PyTorch Conv3d NCDHW layout.

    One fused pre-pass (transpose to channels-last + cast to the MXU feed
    dtype) is unavoidable for this layout; everything else is the kernel.
    Returns (N, O, D, H, CATE_NUM) in `out_dtype` (f32 default = PyTorch parity;
    pass jnp.bfloat16 to halve the output HBM stream when downstream allows)."""
    x_cl = jnp.transpose(embeds, (0, 2, 3, 4, 1)).astype(slab_dtype)  # (N,D,H,W,C)
    y_cl = tem_cnn_local_forward_channels_last(x_cl, weights, biases,
                                               out_dtype=out_dtype)
    return jnp.transpose(y_cl, (0, 4, 1, 2, 3))                       # (N,O,D,H,W)


def _reference_forward(embeds, weights, biases, *, compute_dtype=jnp.bfloat16,
                       precision=None):
    """Pure-JAX reference (eval mode).  Operands are cast to `compute_dtype` to
    mirror the kernel's MXU feed dtype; accumulation is f32."""
    x = embeds.astype(compute_dtype)
    pad = (KERNEL_SIZE - 1) // 2
    outs = []
    for w, b in zip(weights, biases):
        y = lax.conv_general_dilated(
            x, w.astype(compute_dtype), window_strides=(1, 1, 1),
            padding=((0, 0), (pad, pad), (0, 0)),
            dimension_numbers=("NCDHW", "OIDHW", "NCDHW"),
            precision=precision,
            preferred_element_type=jnp.float32)
        outs.append(y + b.reshape(1, -1, 1, 1, 1).astype(jnp.float32))
    z = jnp.concatenate(outs, axis=-1) + x.astype(jnp.float32)
    return jnp.where(z >= 0, z, NEG_SLOPE * z)


def init_params(key, input_dim, output_dim):
    """Deterministic Conv3d-style init: uniform(-1/sqrt(fan_in), 1/sqrt(fan_in))."""
    fan_in = input_dim * 1 * KERNEL_SIZE * CATE_NUM
    bound = 1.0 / jnp.sqrt(jnp.float32(fan_in))
    weights, biases = [], []
    for i in range(4):
        kw, kb = jax.random.split(jax.random.fold_in(key, i))
        w = jax.random.uniform(kw, (output_dim, input_dim, 1, KERNEL_SIZE, CATE_NUM),
                               jnp.float32, -bound, bound)
        b = jax.random.uniform(kb, (output_dim,), jnp.float32, -bound, bound)
        weights.append(w)
        biases.append(b)
    return weights, biases


if __name__ == "__main__":
    key = jax.random.PRNGKey(0)
    # batch, channels (=input_dim=output_dim), regions, time steps.
    # C = 32 -> WC = 4*C = 128: lane-dense loads/stores and a full-depth MXU feed.
    N, C, D, H = 2, 32, 4, 16
    x = jax.random.normal(jax.random.fold_in(key, 1), (N, C, D, H, CATE_NUM),
                          jnp.float32)
    weights, biases = init_params(jax.random.fold_in(key, 2), C, C)

    out = jax.block_until_ready(tem_cnn_local_forward(x, weights, biases))
    assert out.shape == (N, C, D, H, CATE_NUM), out.shape
    assert out.dtype == jnp.float32, out.dtype

    # Primary check: reference with matched bf16 operand rounding (the MXU runs
    # single-pass bf16 at default precision in both paths, f32 accumulate).
    ref_bf16 = jax.block_until_ready(
        _reference_forward(x, weights, biases, compute_dtype=jnp.bfloat16))
    err = float(jnp.max(jnp.abs(out - ref_bf16)))
    assert err < 1e-2, f"mismatch vs matched-bf16 reference: {err}"

    # Coarse sanity bound vs true f32 math (documents bf16 quantisation error;
    # a mis-wired tap/residual would blow far past this).
    ref_f32 = jax.block_until_ready(
        _reference_forward(x, weights, biases, compute_dtype=jnp.float32,
                           precision=lax.Precision.HIGHEST))
    err_q = float(jnp.max(jnp.abs(out - ref_f32)))
    assert err_q < 0.15, f"quantisation error larger than expected: {err_q}"

    print("KERNEL_OK")
</pallas_src>

<mosaic_0001>
module attributes {stable_mosaic.version = 11 : i64} {
  func.func @_tem_cnn_kernel(%arg0: i32, %arg1: memref<32x128xbf16, #tpu.memory_space<vmem>>, %arg2: memref<3x128x128xbf16, #tpu.memory_space<vmem>>, %arg3: memref<1x128xf32, #tpu.memory_space<vmem>>, %arg4: memref<32x128xf32, #tpu.memory_space<vmem>>) attributes {dimension_semantics = [#tpu.dimension_semantics<parallel>], iteration_bounds = array<i64: 4>, scalar_prefetch = 0 : i64, scratch_operands = 0 : i64, tpu.core_type = #tpu.core_type<tc>, window_params = [{transform_indices = @transform_0, window_bounds = array<i64: 32, 128>}, {pipeline_mode = #tpu.pipeline_mode<synchronous>, transform_indices = @transform_1, window_bounds = array<i64: 3, 128, 128>}, {pipeline_mode = #tpu.pipeline_mode<synchronous>, transform_indices = @transform_2, window_bounds = array<i64: 1, 128>}, {transform_indices = @transform_3, window_bounds = array<i64: 32, 128>}]} {
    %c0 = arith.constant 0 : index
    %c0_0 = arith.constant 0 : index
    %0 = vector.load %arg1[%c0, %c0_0] : memref<32x128xbf16, #tpu.memory_space<vmem>>, vector<32x128xbf16>
    %1 = tpu.iota {dimensions = array<i32: 0>} : vector<32x1xi32>
    %c16_i32 = arith.constant 16 : i32
    %c0_i32 = arith.constant 0 : i32
    %2 = arith.cmpi eq, %c16_i32, %c0_i32 : i32
    %c1_i32 = arith.constant 1 : i32
    %3 = arith.select %2, %c1_i32, %c16_i32 : i32
    %4 = vector.broadcast %3 : i32 to vector<32x1xi32>
    %5 = arith.remsi %1, %4 : vector<32x1xi32>
    %c0_i32_1 = arith.constant 0 : i32
    %6 = vector.broadcast %c0_i32_1 : i32 to vector<32x1xi32>
    %7 = arith.cmpi ne, %5, %6 : vector<32x1xi32>
    %c0_i32_2 = arith.constant 0 : i32
    %8 = vector.broadcast %c0_i32_2 : i32 to vector<32x1xi32>
    %9 = arith.cmpi slt, %5, %8 : vector<32x1xi32>
    %c0_i32_3 = arith.constant 0 : i32
    %10 = arith.cmpi slt, %3, %c0_i32_3 : i32
    %11 = vector.broadcast %10 : i1 to vector<32x1xi1>
    %12 = vector.broadcast %11 : vector<32x1xi1> to vector<32x1xi1>
    %13 = arith.xori %9, %12 : vector<32x1xi1>
    %14 = arith.andi %13, %7 : vector<32x1xi1>
    %15 = vector.broadcast %3 : i32 to vector<32x1xi32>
    %16 = arith.addi %5, %15 : vector<32x1xi32>
    %17 = arith.select %14, %16, %5 : vector<32x1xi1>, vector<32x1xi32>
    %c0_4 = arith.constant 0 : index
    %c0_5 = arith.constant 0 : index
    %18 = vector.load %arg3[%c0_4, %c0_5] : memref<1x128xf32, #tpu.memory_space<vmem>>, vector<1x128xf32>
    %19 = arith.extf %0 : vector<32x128xbf16> to vector<32x128xf32>
    %20 = vector.broadcast %18 : vector<1x128xf32> to vector<32x128xf32>
    %21 = arith.addf %20, %19 : vector<32x128xf32>
    %c0_6 = arith.constant 0 : index
    %c0_7 = arith.constant 0 : index
    %c0_8 = arith.constant 0 : index
    %22 = vector.load %arg2[%c0_6, %c0_7, %c0_8] : memref<3x128x128xbf16, #tpu.memory_space<vmem>>, vector<1x128x128xbf16>
    %23 = vector.shape_cast %22 : vector<1x128x128xbf16> to vector<128x128xbf16>
    %cst = arith.constant dense<0.000000e+00> : vector<32x128xf32>
    %24 = tpu.matmul %0, %23, %cst {dimension_numbers = #tpu.dot_dimension_numbers<[1], [0], [0], [1], [0, 0, 1, 1], [], []>} : vector<32x128xbf16>, vector<128x128xbf16>, vector<32x128xf32> -> vector<32x128xf32>
    %c1_i32_9 = arith.constant 1 : i32
    %25 = tpu.dynamic_rotate %24 by %c1_i32_9 dim 0 : vector<32x128xf32>, i32 -> vector<32x128xf32>
    %c-1_i32 = arith.constant -1 : i32
    %26 = vector.broadcast %c-1_i32 : i32 to vector<32x1xi32>
    %27 = arith.addi %17, %26 : vector<32x1xi32>
    %c0_i32_10 = arith.constant 0 : i32
    %28 = vector.broadcast %c0_i32_10 : i32 to vector<32x1xi32>
    %29 = arith.cmpi sge, %27, %28 : vector<32x1xi32>
    %c-1_i32_11 = arith.constant -1 : i32
    %30 = vector.broadcast %c-1_i32_11 : i32 to vector<32x1xi32>
    %31 = arith.addi %17, %30 : vector<32x1xi32>
    %c15_i32 = arith.constant 15 : i32
    %32 = vector.broadcast %c15_i32 : i32 to vector<32x1xi32>
    %33 = arith.cmpi sle, %31, %32 : vector<32x1xi32>
    %34 = arith.andi %29, %33 : vector<32x1xi1>
    %cst_12 = arith.constant 0.000000e+00 : f32
    %35 = vector.shape_cast %34 : vector<32x1xi1> to vector<32x1xi1>
    %36 = vector.broadcast %35 : vector<32x1xi1> to vector<32x128xi1>
    %37 = vector.broadcast %cst_12 : f32 to vector<32x128xf32>
    %38 = arith.select %36, %25, %37 : vector<32x128xi1>, vector<32x128xf32>
    %39 = arith.addf %21, %38 : vector<32x128xf32>
    %c1 = arith.constant 1 : index
    %c0_13 = arith.constant 0 : index
    %c0_14 = arith.constant 0 : index
    %40 = vector.load %arg2[%c1, %c0_13, %c0_14] : memref<3x128x128xbf16, #tpu.memory_space<vmem>>, vector<1x128x128xbf16>
    %41 = vector.shape_cast %40 : vector<1x128x128xbf16> to vector<128x128xbf16>
    %cst_15 = arith.constant dense<0.000000e+00> : vector<32x128xf32>
    %42 = tpu.matmul %0, %41, %cst_15 {dimension_numbers = #tpu.dot_dimension_numbers<[1], [0], [0], [1], [0, 0, 1, 1], [], []>} : vector<32x128xbf16>, vector<128x128xbf16>, vector<32x128xf32> -> vector<32x128xf32>
    %43 = arith.addf %39, %42 : vector<32x128xf32>
    %c2 = arith.constant 2 : index
    %c0_16 = arith.constant 0 : index
    %c0_17 = arith.constant 0 : index
    %44 = vector.load %arg2[%c2, %c0_16, %c0_17] : memref<3x128x128xbf16, #tpu.memory_space<vmem>>, vector<1x128x128xbf16>
    %45 = vector.shape_cast %44 : vector<1x128x128xbf16> to vector<128x128xbf16>
    %cst_18 = arith.constant dense<0.000000e+00> : vector<32x128xf32>
    %46 = tpu.matmul %0, %45, %cst_18 {dimension_numbers = #tpu.dot_dimension_numbers<[1], [0], [0], [1], [0, 0, 1, 1], [], []>} : vector<32x128xbf16>, vector<128x128xbf16>, vector<32x128xf32> -> vector<32x128xf32>
    %c31_i32 = arith.constant 31 : i32
    %47 = tpu.dynamic_rotate %46 by %c31_i32 dim 0 : vector<32x128xf32>, i32 -> vector<32x128xf32>
    %c1_i32_19 = arith.constant 1 : i32
    %48 = vector.broadcast %c1_i32_19 : i32 to vector<32x1xi32>
    %49 = arith.addi %17, %48 : vector<32x1xi32>
    %c0_i32_20 = arith.constant 0 : i32
    %50 = vector.broadcast %c0_i32_20 : i32 to vector<32x1xi32>
    %51 = arith.cmpi sge, %49, %50 : vector<32x1xi32>
    %c1_i32_21 = arith.constant 1 : i32
    %52 = vector.broadcast %c1_i32_21 : i32 to vector<32x1xi32>
    %53 = arith.addi %17, %52 : vector<32x1xi32>
    %c15_i32_22 = arith.constant 15 : i32
    %54 = vector.broadcast %c15_i32_22 : i32 to vector<32x1xi32>
    %55 = arith.cmpi sle, %53, %54 : vector<32x1xi32>
    %56 = arith.andi %51, %55 : vector<32x1xi1>
    %cst_23 = arith.constant 0.000000e+00 : f32
    %57 = vector.shape_cast %56 : vector<32x1xi1> to vector<32x1xi1>
    %58 = vector.broadcast %57 : vector<32x1xi1> to vector<32x128xi1>
    %59 = vector.broadcast %cst_23 : f32 to vector<32x128xf32>
    %60 = arith.select %58, %47, %59 : vector<32x128xi1>, vector<32x128xf32>
    %61 = arith.addf %43, %60 : vector<32x128xf32>
    %cst_24 = arith.constant 0.000000e+00 : f32
    %62 = vector.broadcast %cst_24 : f32 to vector<32x128xf32>
    %63 = arith.cmpf oge, %61, %62 : vector<32x128xf32>
    %cst_25 = arith.constant 0.00999999977 : f32
    %64 = vector.broadcast %cst_25 : f32 to vector<32x128xf32>
    %65 = arith.mulf %64, %61 : vector<32x128xf32>
    %66 = arith.select %63, %61, %65 : vector<32x128xi1>, vector<32x128xf32>
    %c0_26 = arith.constant 0 : index
    %c0_27 = arith.constant 0 : index
    %67 = vector.load %arg4[%c0_26, %c0_27] : memref<32x128xf32, #tpu.memory_space<vmem>>, vector<32x128xf32>
    tpu.vector_store %arg4[%c0_26, %c0_27], %66 {strides = array<i32>} : memref<32x128xf32, #tpu.memory_space<vmem>>, vector<32x128xf32>,
    return
  }
  func.func @transform_0(%arg0: i32) -> (i32, i32) {
    %c0_i32 = arith.constant 0 : i32
    %c0_i32_0 = arith.constant 0 : i32
    return %arg0, %c0_i32 : i32, i32
  }
  func.func @transform_1(%arg0: i32) -> (i32, i32, i32) {
    %c0_i32 = arith.constant 0 : i32
    %c0_i32_0 = arith.constant 0 : i32
    %c0_i32_1 = arith.constant 0 : i32
    %c0_i32_2 = arith.constant 0 : i32
    return %c0_i32, %c0_i32_0, %c0_i32_1 : i32, i32, i32
  }
  func.func @transform_2(%arg0: i32) -> (i32, i32) {
    %c0_i32 = arith.constant 0 : i32
    %c0_i32_0 = arith.constant 0 : i32
    %c0_i32_1 = arith.constant 0 : i32
    return %c0_i32, %c0_i32_0 : i32, i32
  }
  func.func @transform_3(%arg0: i32) -> (i32, i32) {
    %c0_i32 = arith.constant 0 : i32
    %c0_i32_0 = arith.constant 0 : i32
    return %arg0, %c0_i32 : i32, i32
  }
}

</mosaic_0001>

<bundles_post_ra>
// kernel: tpu_custom_call.1
= control target key start
LH: loop header
LB: loop body
LE: loop exit
PB: predicated region body
PF: predicated region fallthrough
CT: control target
= control target key end

     0   :  { %8 = vsyncpa [#allocation3], 0  ;;  %s1305_s0 = inlined_call_operand.hbm [shape: bf16[128,128], index: 0, kind: input, shape index: {}]   ;;  %s1306_s1 = inlined_call_operand.hbm [shape: bf16[3,128,128], index: 1, kind: input, shape index: {}]   ;;  %s1307_s2 = inlined_call_operand.vmem [shape: f32[1,128], index: 2, kind: input, shape index: {}]   ;;  %s1308_s3 = inlined_call_operand.hbm [shape: f32[128,128], index: 3, kind: output, shape index: {}]  }
   0x1   :  { %10 = vsyncpa [#allocation3 + $0x1], 0 }
   0x2   :  { %11 = vsyncpa [#allocation6], 0 }
   0x3   :  { %12 = vsyncpa [#allocation4], 0 }
   0x4   :  { %14 = vsyncpa [#allocation4 + $0x1], 0  ;;  %s1118_s12 = smov 0   ;;  %s1120_s13 = smov 0  }
   0x5   :  { %s1122_s14 = smov 0   ;;  %s1124_s15 = smov 0  }
   0x6 LB: > { %s1139_s16 = sadd.s32 4294967295, %s1091_s15   ;;  %s743_s17 = sadd.s32 4294967294, %s1091_s15   ;;  %s1091_s15 = sphi %s1124_s15, %s1317_s15   ;;  %s1087_s14 = sphi %s1122_s14, %s1316_s14   ;;  %s1083_s13 = sphi %s1120_s13, %s1315_s13   ;;  %s1079_s12 = sphi %s1118_s12, %s1314_s12  }
   0x7   : > { %p40_p0 = scmp.ne.s32.totalorder %s1083_s13, %s1079_s12  ;;  %p41_p1 = scmp.eq.s32.totalorder %s1139_s16, 0 }
   0x8   : > { %p106_p2 = scmp.eq.s32.totalorder %s1139_s16, 3  ;;  %p112_p3 = scmp.eq.s32.totalorder %s743_s17, 3 }
   0x9   : > { %p1148_p4 = por %p41_p1, %p40_p0  ;;  %p744_p5 = scmp.ge.s32.totalorder %s1091_s15, 1 }
   0xa   : > { %p1153_p6 = por %p112_p3, %p40_p0  ;;  %p119_p7 = scmp.lt.s32.totalorder %s1091_s15, 5 }
   0xb   : > { %s130_s22 = sshll.u32 %s1306_s1, 4  ;;  %s1093_s24 = smov [#allocation5]   ;;  %s131_s22 = int_to_ptr.hbm [resolvable:$true] %s130_s22 }
   0xc   : > { %p1161_p8 = pnand %p744_p5, %p119_p7  ;;  %s132_s25 = sshll.u32 %s1093_s24, 4  ;;  %s133_s25 = int_to_ptr.vmem [resolvable:$true] %s132_s25 }
   0xd   : > { %s1170_s26 = sadd.s32 1, %s1091_s15   ;;  %s1094_s27 = smov 64  }
   0xe   : > { %p907_p9 = pneg %p1161_p8  ;;  %s1095_s28 = smov 4  }
   0xf   : > { %s24_s29 = ssub.s32 %s1091_s15, %s1170_s26  ;;  %s27_s30 = sadd.s32 1, %s1087_s14 }
  0x10   : > { %p908_p10 = pnand %p907_p9, %p41_p1  ;;  %p25_p11 = scmp.eq.s32.totalorder %s24_s29, 0 }
  0x11   : > { %p34_p12 = scmp.ne.s32.totalorder %s1087_s14, %s1083_s13  ;;  %p35_p13 = scmp.eq.s32.totalorder %s1091_s15, 0 }
  0x12   : > { %910 = dma.hbm_to_vmem [thread:$0]  (!%p908_p10), %s131_s22, 3072, %s133_s25, [#allocation6], %s1094_s27, %s1094_s27, %s1095_s28  }
  0x13   : > { %s1182_s4 = scalar_select %p25_p11, %s1087_s14, %s27_s30  }
  0x14   : > { %p1186_p0 = por %p106_p2, %p34_p12  ;;  %p920_p3 = scmp.lt.s32.totalorder %s1091_s15, 4 }
  0x15   : > { %s149_s6 = sand.u32 1, %s1087_s14   ;;  %s863_s7 = sshll.u32 %s1091_s15, 4 }
  0x16   : > { %p36_p5 = por %p35_p13, %p34_p12  ;;  %s747_s8 = sshll.u32 %s149_s6, 4 }
  0x17   : > { %s158_s11 = scalar_lea.hbm %s1305_s0, %s863_s7  ;;  %s153_s20 = scalar_lea.vmem [#allocation2], %s747_s8 }
  0x18   : > { %s159_s17 = sshll.u32 %s158_s11, 4  ;;  %s161_s21 = sshll.u32 %s153_s20, 4  ;;  %s160_s17 = int_to_ptr.hbm [resolvable:$true] %s159_s17  ;;  %s162_s21 = int_to_ptr.vmem [resolvable:$true] %s161_s21 }
  0x19   : > { %p1196_p7 = pnand %p920_p3, %p36_p5  ;;  %s150_s24 = scalar_lea.sflag [#allocation3], %s149_s6 }
  0x1a   : > { %s991_s25 = sshra.s32 %s160_s17, 4  ;;  %s998_s8 = scalar_lea.hbm %s1305_s0, 64  ;;  %s992_s25 = int_to_ptr.hbm [resolvable:$true] %s991_s25 }
  0x1b   : > { %s993_s29 = scalar_lea.hbm %s992_s25, 16  ;;  %p995_p9 = pneg %p1196_p7 }
  0x1c   : > { %p994_p2 = scmp.ne.s32.totalorder %s992_s25, %s993_s29  ;;  %p999_p12 = scmp.lt.s32.totalorder %s992_s25, %s1305_s0 }
  0x1d   : > { %p1000_p13 = scmp.lt.s32.totalorder %s998_s8, %s993_s29 }
  0x1e   : > { %p996_p10 = pnand %p995_p9, %p994_p2 }
  0x1f   : > { %p1001_p3 = por %p1000_p13, %p999_p12 }
  0x20   : > { %p997_p11 = pneg %p996_p10 }
  0x22   : > { %p1002_p5 = pnand %p1001_p3, %p997_p11 }
  0x24   : > { %1005 = shalt.err (!%p1002_p5)
}
  0x25   : > { %914 = dma.hbm_to_vmem [thread:$0]  (!%p1196_p7), %s160_s17, 256, %s162_s21, %s150_s24, %s1094_s27, %s1094_s27, %s1095_s28  }
  0x26   : > { %173 = sbr.rel (%p1161_p8) target bundleno = 249 (0xf9), region = 32  ;;  %s1216_s6 = sand.u32 (!%p1161_p8), 1, %s1083_s13  }
  0x27   : > { %s751_s11 = sshll.u32 (!%p1161_p8), %s1216_s6, 4  ;;  %s176_s20 = scalar_lea.sflag (!%p1161_p8), [#allocation3], %s1216_s6 }
  0x28   : > { %s1220_s25 = scalar_lea.vmem (!%p1161_p8), [#allocation2], %s751_s11 }
  0x2b   : > { %1066 = dma.done.wait (%p1148_p4), %s176_s20, 256  }
  0x2c   : > { %1068 = vsyncadd (%p1148_p4), %s176_s20, 4294967040 }
  0x2d   : > { %1070 = dma.done.wait (%p41_p1), [#allocation6], 3072  }
  0x2e   : > { %1072 = vsyncadd (%p41_p1), [#allocation6], 4294964224  ;;  %v873_v0 = vld [vmem:[#allocation5 + $0x38] sm:$0xff]  ;;  %v872_v3 = vld [vmem:[#allocation5 + $0x30] sm:$0xff]  ;;  %v214_v26 = vlaneseq  ;;  %s753_s27 = sshll.u32 %s1216_s6, 5  ;;  %s890_s17 = sshll.u32 %s1139_s16, 5 }
  0x2f   : > { %v881_v1 = vld [vmem:[#allocation5 + $0x78] sm:$0xff]  ;;  %355 = vmatpush.bf16.msra.mxu0 %v873_v0  ;;  %891 = vmatpush.bf16.msra.mxu3 %v873_v0  ;;  %v880_v4 = vld [vmem:[#allocation5 + $0x70] sm:$0xff]  ;;  %v871_v6 = vld [vmem:[#allocation5 + $0x28] sm:$0xff]  ;;  %s1262_s28 = scalar_lea.vmem [#allocation7], %s753_s27  ;;  %s656_s24 = scalar_lea.hbm %s1308_s3, %s890_s17 }
  0x30   : > { %v889_v2 = vld [vmem:[#allocation5 + $0xb8] sm:$0xff]  ;;  %480 = vmatpush.bf16.msra.mxu1 %v881_v1  ;;  %v888_v5 = vld [vmem:[#allocation5 + $0xb0] sm:$0xff]  ;;  %v879_v7 = vld [vmem:[#allocation5 + $0x68] sm:$0xff]  ;;  %v1232_v29 = vshrl.u32 %v214_v26, 7  ;;  %s657_s16 = sshll.u32 %s1262_s28, 4  ;;  %s659_s29 = sshll.u32 %s656_s24, 4  ;;  %s658_s16 = int_to_ptr.vmem [resolvable:$true] %s657_s16  ;;  %s660_s29 = int_to_ptr.hbm [resolvable:$true] %s659_s29 }
  0x31   : > { %568 = vmatpush.bf16.msra.mxu2 %v889_v2  ;;  %v887_v8 = vld [vmem:[#allocation5 + $0xa8] sm:$0xff]  ;;  %v870_v9 = vld [vmem:[#allocation5 + $0x20] sm:$0xff]  ;;  %v869_v12 = vld [vmem:[#allocation5 + $0x18] sm:$0xff]  ;;  %s645_s30 = scalar_lea.sflag [#allocation4], %s1216_s6  ;;  %s1035_s7 = sshra.s32 %s660_s29, 4  ;;  %s1036_s7 = int_to_ptr.hbm [resolvable:$true] %s1035_s7 }
  0x32   : > { %v878_v10 = vld [vmem:[#allocation5 + $0x60] sm:$0xff]  ;;  %v877_v13 = vld [vmem:[#allocation5 + $0x58] sm:$0xff]  ;;  %v868_v15 = vld [vmem:[#allocation5 + $0x10] sm:$0xff]  ;;  %v223_v31 = vand.u32 15, %v1232_v29  ;;  %v217_v38 = vadd.s32 16, %v1232_v29  ;;  %v216_v41 = vadd.s32 8, %v1232_v29  ;;  %p1042_p7 = scmp.lt.s32.totalorder %s1036_s7, %s1308_s3 }
  0x33   : > { %356 = vmatpush.bf16.msra.mxu0 %v872_v3  ;;  %892 = vmatpush.bf16.msra.mxu3 %v872_v3  ;;  %v886_v11 = vld [vmem:[#allocation5 + $0xa0] sm:$0xff]  ;;  %v885_v14 = vld [vmem:[#allocation5 + $0x98] sm:$0xff]  ;;  %v876_v16 = vld [vmem:[#allocation5 + $0x50] sm:$0xff]  ;;  %vm378_vm1 = vcmp.lt.s32.totalorder %v1232_v29, 1  ;;  %vm591_vm2 = vcmp.lt.s32.totalorder %v1232_v29, 7  ;;  %v218_v62 = vadd.s32 24, %v1232_v29 }
  0x34   : > { %481 = vmatpush.bf16.msra.mxu1 %v880_v4  ;;  %v884_v17 = vld [vmem:[#allocation5 + $0x90] sm:$0xff]  ;;  %v867_v18 = vld [vmem:[#allocation5 + $0x8] sm:$0xff]  ;;  %v866_v21 = vld [vmem:[#allocation5] sm:$0xff]  ;;  %v383_v35 = vadd.s32 4294967295, %v223_v31  ;;  %v237_v49 = vand.u32 15, %v217_v38  ;;  %v230_v50 = vand.u32 15, %v216_v41 }
  0x35   : > { %569 = vmatpush.bf16.msra.mxu2 %v888_v5  ;;  %v875_v19 = vld [vmem:[#allocation5 + $0x48] sm:$0xff]  ;;  %v874_v22 = vld [vmem:[#allocation5 + $0x40] sm:$0xff]  ;;  %s1037_s8 = scalar_lea.hbm %s1036_s7, 32  ;;  %s1041_s11 = scalar_lea.hbm %s1308_s3, 128 }
  0x36   : > { %v883_v20 = vld [vmem:[#allocation5 + $0x88] sm:$0xff]  ;;  %v882_v23 = vld [vmem:[#allocation5 + $0x80] sm:$0xff]  ;;  %vm387_vm0 = vcmp.ge.s32.totalorder %v383_v35, 0  ;;  %v385_v58 = vadd.s32 4294967295, %v237_v49  ;;  %v597_v61 = vadd.s32 1, %v230_v50  ;;  %p1038_p1 = scmp.ne.s32.totalorder %s1036_s7, %s1037_s8  ;;  %p1043_p2 = scmp.lt.s32.totalorder %s1041_s11, %s1037_s8 }
  0x37   : > { %357 = vmatpush.bf16.msra.mxu0 %v871_v6  ;;  %893 = vmatpush.bf16.msra.mxu3 %v871_v6  ;;  %v864_v24 = vld [vmem:[%s1220_s25] sm:$0xff]  ;;  %v865_v25 = vld [vmem:[%s1220_s25 + $0x8] sm:$0xff] }
  0x38   : > { %482 = vmatpush.bf16.msra.mxu1 %v879_v7  ;;  %v210_v33 = vld [vmem:[%s1220_s25] sm:$0xf]  ;;  %v211_v36 = vld [vmem:[%s1220_s25 + $0x4] sm:$0xff]   ;;  %v213_v59 = vld [vmem:[%s1220_s25 + $0xc] sm:$0xf]  ;;  %vm389_vm3 = vcmp.ge.s32.totalorder %v385_v58, 0  ;;  %p1039_p4 = pnand %p1038_p1, %p1186_p0  ;;  %p1044_p9 = por %p1043_p2, %p1042_p7 }
  0x39   : > { %570 = vmatpush.bf16.msra.mxu2 %v887_v8  ;;  %v268_v34 = vunpack.c.l.bf16 %v210_v33  ;;  %v960_v40 = vld [vmem:[%s1307_s2] ss:$0 sm:$0xff]  ;;  %v269_v42 = vunpack.c.l.bf16 %v211_v36  ;;  %v270_v0 = vunpack.c.h.bf16 %v211_v36  ;;  %v271_v4 = vunpack.c.l.bf16 %v213_v59 }
  0x3a   : > { %vm605_vm4 = vcmp.le.s32.totalorder %v597_v61, 15  ;;  %p1040_p8 = pneg %p1039_p4 }
  0x3b   : > { %358 = vmatpush.bf16.msra.mxu0 %v870_v9  ;;  %894 = vmatpush.bf16.msra.mxu3 %v870_v9  ;;  %v275_v43 = vadd.f32 %v960_v40, %v268_v34  ;;  %v276_v52 = vadd.f32 %v960_v40, %v269_v42  ;;  %v244_v9 = vand.u32 15, %v218_v62 }
  0x3c   : > { %483 = vmatpush.bf16.msra.mxu1 %v878_v10  ;;  %p1045_p10 = pnand %p1044_p9, %p1040_p8 }
  0x3d   : > { %571 = vmatpush.bf16.msra.mxu2 %v886_v11  ;;  %v277_v11 = vadd.f32 %v960_v40, %v270_v0 }
  0x3f   : > { %359 = vmatpush.bf16.msra.mxu0 %v869_v12  ;;  %895 = vmatpush.bf16.msra.mxu3 %v869_v12 }
  0x40   : > { %484 = vmatpush.bf16.msra.mxu1 %v877_v13 }
  0x41   : > { %572 = vmatpush.bf16.msra.mxu2 %v885_v14 }
  0x43   : > { %360 = vmatpush.bf16.msra.mxu0 %v868_v15  ;;  %896 = vmatpush.bf16.msra.mxu3 %v868_v15  ;;  %v278_v15 = vadd.f32 %v960_v40, %v271_v4 }
  0x44   : > { %485 = vmatpush.bf16.msra.mxu1 %v876_v16 }
  0x45   : > { %573 = vmatpush.bf16.msra.mxu2 %v884_v17 }
  0x47   : > { %361 = vmatpush.bf16.msra.mxu0 %v867_v18  ;;  %897 = vmatpush.bf16.msra.mxu3 %v867_v18 }
  0x48   : > { %486 = vmatpush.bf16.msra.mxu1 %v875_v19 }
  0x49   : > { %574 = vmatpush.bf16.msra.mxu2 %v883_v20  ;;  %v599_v20 = vadd.s32 1, %v244_v9 }
  0x4b   : > { %362 = vmatpush.bf16.msra.mxu0 %v866_v21  ;;  %898 = vmatpush.bf16.msra.mxu3 %v866_v21  ;;  %vm607_vm7 = vcmp.le.s32.totalorder %v599_v20, 15 }
  0x4c   : > { %487 = vmatpush.bf16.msra.mxu1 %v874_v22 }
  0x4d   : > { %575 = vmatpush.bf16.msra.mxu2 %v882_v23 }
  0x4e   : > { %363 = vmatmul.bf16.vlgmr.msra.gmra.mxu0 %v864_v24  ;;  %368 = vmatmul.bf16.vlgmr.msra.gmra.mxu3 %v865_v25 }
  0x4f   : > { %488 = vmatmul.bf16.vlgmr.msra.gmra.mxu1 %v864_v24 }
  0x50   : > { %576 = vmatmul.bf16.vlgmr.msra.gmra.mxu2 %v864_v24 }
  0x5f   : > { %493 = vmatmul.bf16.gmra.mxu1 %v865_v25 }
  0x60   : > { %581 = vmatmul.bf16.gmra.mxu2 %v865_v25 }
  0xcb   : > { %v364_v28 = vpop.f32.mrf.mxu0 }
  0xcc   : > { %v489_v27 = vpop.f32.mrf.mxu1  ;;  %v374_v45 = vrot.slane %v364_v28, 7 }
  0xd1   : > { %v369_v30 = vpop.f32.mrf.mxu3 }
  0xd2   : > { %v376_v55 = vrot.slane %v369_v30, 7 }
  0xd3   : > { %v1235_v32 = vpop.f32.mrf.mxu2  ;;  %v366_v39 = vpop.f32.mrf.mxu0 }
  0xd4   : > { %v491_v37 = vpop.f32.mrf.mxu1  ;;  %v375_v46 = vrot.slane %v366_v39, 7  ;;  %v587_v60 = vrot.slane %v1235_v32, 1 }
  0xd6   : > { %v381_v56 = vsel %vm378_vm1, %v374_v45, %v375_v46  ;;  %v380_v5 = vsel %vm378_vm1, %v375_v46, %v376_v55 }
  0xd7   : > { %v412_v2 = vadd.f32 %v381_v56, %v276_v52  ;;  %v409_v13 = vsel %vm389_vm3, %v380_v5, 0.0 }
  0xd8   : > { %v413_v21 = vadd.f32 %v409_v13, %v277_v11 }
  0xd9   : > { %v371_v44 = vpop.f32.mrf.mxu3  ;;  %v500_v12 = vadd.f32 %v491_v37, %v412_v2 }
  0xda   : > { %v377_v47 = vrot.slane %v371_v44, 7 }
  0xdb   : > { %v579_v48 = vpop.f32.mrf.mxu2 }
  0xdc   : > { %v382_v51 = vsel %vm378_vm1, %v377_v47, %v374_v45  ;;  %v588_v54 = vrot.slane %v579_v48, 1  ;;  %v494_v1 = vpop.f32.mrf.mxu1  ;;  %v379_v18 = vsel %vm378_vm1, %v376_v55, %v377_v47 }
  0xdd   : > { %v407_v53 = vsel %vm387_vm0, %v382_v51, 0.0  ;;  %v414_v23 = vadd.f32 %v379_v18, %v278_v15  ;;  %v501_v28 = vadd.f32 %v494_v1, %v413_v21 }
  0xde   : > { %v411_v57 = vadd.f32 %v407_v53, %v275_v43  ;;  %v594_v3 = vsel %vm591_vm2, %v587_v60, %v588_v54 }
  0xe0   : > { %v499_v63 = vadd.f32 %v489_v27, %v411_v57 }
  0xe2   : > { %v624_v6 = vadd.f32 %v594_v3, %v499_v63 }
  0xe3   : > { %v582_v7 = vpop.f32.mrf.mxu2 }
  0xe4   : > { %v589_v8 = vrot.slane %v582_v7, 1  ;;  %vm628_vm5 = vcmp.ge.f32.partialorder %v624_v6, 0.0  ;;  %v632_v10 = vmul.f32 0.01, %v624_v6  ;;  %v496_v24 = vpop.f32.mrf.mxu1 }
  0xe5   : > { %v502_v30 = vadd.f32 %v496_v24, %v414_v23 }
  0xe6   : > { %v593_v14 = vsel %vm591_vm2, %v588_v54, %v589_v8  ;;  %v636_v16 = vsel %vm628_vm5, %v624_v6, %v632_v10 }
  0xe7   : > { %v621_v17 = vsel %vm605_vm4, %v593_v14, 0.0  ;;  %640 = vst [vmem:[%s1262_s28] sm:$0xff] %v636_v16 }
  0xe8   : > { %v625_v19 = vadd.f32 %v621_v17, %v500_v12 }
  0xea   : > { %vm629_vm6 = vcmp.ge.f32.partialorder %v625_v19, 0.0  ;;  %v633_v22 = vmul.f32 0.01, %v625_v19 }
  0xeb   : > { %v584_v25 = vpop.f32.mrf.mxu2 }
  0xec   : > { %v637_v26 = vsel %vm629_vm6, %v625_v19, %v633_v22  ;;  %v590_v27 = vrot.slane %v584_v25, 1 }
  0xed   : > { %641 = vst [vmem:[%s1262_s28 + $0x8] sm:$0xff] %v637_v26 }
  0xee   : > { %v592_v31 = vsel %vm591_vm2, %v589_v8, %v590_v27  ;;  %v595_v32 = vsel %vm591_vm2, %v590_v27, %v587_v60 }
  0xef   : > { %v623_v33 = vsel %vm607_vm7, %v595_v32, 0.0  ;;  %v626_v34 = vadd.f32 %v592_v31, %v501_v28 }
  0xf0   : > { %v627_v35 = vadd.f32 %v623_v33, %v502_v30 }
  0xf1   : > { %vm630_vm8 = vcmp.ge.f32.partialorder %v626_v34, 0.0  ;;  %v634_v36 = vmul.f32 0.01, %v626_v34 }
  0xf2   : > { %vm631_vm9 = vcmp.ge.f32.partialorder %v627_v35, 0.0  ;;  %v635_v37 = vmul.f32 0.01, %v627_v35 }
  0xf3   : > { %v638_v38 = vsel %vm630_vm8, %v626_v34, %v634_v36 }
  0xf4   : > { %v639_v39 = vsel %vm631_vm9, %v627_v35, %v635_v37  ;;  %642 = vst [vmem:[%s1262_s28 + $0x10] sm:$0xff] %v638_v38 }
  0xf5   : > { %643 = vst [vmem:[%s1262_s28 + $0x18] sm:$0xff] %v639_v39 }
  0xf6   : > { %1048 = shalt.err (!%p1045_p10)
}
  0xf7   : > { %s1096_s6 = smov 128   ;;  %s1097_s18 = smov 8  }
  0xf8   : > { %905 = dma.vmem_to_hbm [thread:$0]  (%p1186_p0), %s658_s16, 512, %s660_s29, %s645_s30, %s1096_s6, %s1096_s6, %s1097_s18  }
  0xf9 PF: > { %p922_p11 = scmp.ge.s32.totalorder %s1091_s15, 2  ;;  %s674_s23 = sand.u32 1, %s1079_s12  }
  0xfa   : > { %s675_s27 = scalar_lea.sflag [#allocation4], %s674_s23 }
  0xfb   : > { %p916_p12 = pnand %p922_p11, %p1153_p6 }
  0xfd   : > { %p917_p13 = pneg %p916_p12 }
  0xff   : > { %1074 = dma.done.wait (%p917_p13), %s675_s27, 512  }
 0x100   : > { %1076 = vsyncadd (%p917_p13), %s675_s27, 4294966784  ;;  %p17_p3 = scmp.ge.s32.totalorder %s1170_s26, 6   ;;  %s1314_s12 = smov %s1083_s13 }
 0x101   : > { %s1315_s13 = smov %s1087_s14  ;;  %s1316_s14 = smov %s1182_s4 }
 0x102   : > { %s1317_s15 = smov %s1170_s26  ;;  %19 = sbr.rel (!%p17_p3) target bundleno = 6 (0x6), region = 83 }
 0x107   :  { %681 = vsyncpa [#allocation3], 1 }
 0x108   :  { %683 = vsyncpa [#allocation3 + $0x1], 1 }
 0x109   :  { %684 = vsyncpa [#allocation6], 1 }
 0x10a   :  { %685 = vsyncpa [#allocation4], 1 }
 0x10b   :  { %687 = vsyncpa [#allocation4 + $0x1], 1 }

</bundles_post_ra>
